<compile_context>
chip_gen: v6e
topology: v6e:2x2x1
jax: 0.10.0
libtpu: 0.0.40
codegen_flags: <defaults>
</compile_context>

<pallas_src>
import math
import functools

import jax
import jax.numpy as jnp
from jax.experimental import pallas as pl
from jax.experimental.pallas import tpu as pltpu

BN_EPS = 1e-5
FUSED_BYTES_CAP = 12 * 1024 * 1024   # VMEM budget under which we use the fully-fused path


# ----------------------------- Pallas kernels ------------------------------

def fused_conv_bn_relu_kernel(w_ref, p_ref, g_ref, b_ref, o_ref, *, inv_m):
    """Whole DecodeBlock core in one kernel (small-M path, grid=(1,)):

    y = (OC, K) @ (K, M) on the MXU, then batch-stat BatchNorm (biased variance) and ReLU,
    all while y stays resident in VMEM.  Conv bias is intentionally omitted: batch-stat BN
    removes any per-channel constant shift, so the bias cannot affect the output.
    """
    y = jnp.dot(w_ref[...], p_ref[...], preferred_element_type=jnp.float32)   # (OC, M) f32
    mean = jnp.sum(y, axis=1, keepdims=True) * inv_m                          # (OC, 1)
    ex2 = jnp.sum(y * y, axis=1, keepdims=True) * inv_m                       # (OC, 1)
    var = jnp.maximum(ex2 - mean * mean, 0.0)
    scale = g_ref[...] * jax.lax.rsqrt(var + BN_EPS)                          # EUP rsqrt
    shift = b_ref[...] - mean * scale
    o_ref[...] = jnp.maximum(y * scale + shift, 0.0)


def conv_stats_kernel(w_ref, p_ref, y_ref, st_ref):
    """Tiled path, pass 1: (OC, K) @ (K, TM) on the MXU + per-tile partial BN sums."""
    y = jnp.dot(w_ref[...], p_ref[...], preferred_element_type=jnp.float32)   # (OC, TM) f32
    y_ref[...] = y
    st_ref[0, :, 0:1] = jnp.sum(y, axis=1, keepdims=True)        # partial sum
    st_ref[0, :, 1:2] = jnp.sum(y * y, axis=1, keepdims=True)    # partial sum of squares


def bn_relu_kernel(y_ref, scale_ref, shift_ref, o_ref):
    """Tiled path, pass 2: y * scale + shift, then ReLU (all f32 elementwise)."""
    o_ref[...] = jnp.maximum(y_ref[...] * scale_ref[...] + shift_ref[...], 0.0)


def matmul_kernel(a_ref, b_ref, o_ref):
    """Plain (R, K) @ (K, TN) tile matmul (used by the separable bilinear upsample)."""
    o_ref[...] = jnp.dot(a_ref[...], b_ref[...], preferred_element_type=jnp.float32)


# ----------------------------- Pallas wrappers -----------------------------

def _cparams(dim_sem):
    # Raise the scoped-VMEM limit above the 16/32 MiB defaults but stay well under
    # v7x's 64 MiB physical VMEM.
    return pltpu.CompilerParams(dimension_semantics=dim_sem,
                                vmem_limit_bytes=48 * 1024 * 1024)


def pick_tile(n, cap=2048):
    """Largest lane tile (multiple of 128, <= cap) dividing n; fall back to full n."""
    for t in (2048, 1024, 512, 256, 128):
        if t <= cap and n >= t and n % t == 0:
            return t
    return n


def fused_conv_bn_relu(w2d_bf16, p_bf16, gamma, beta):
    """Single-kernel DecodeBlock core: conv matmul + batch-stat BN + ReLU, grid=(1,)."""
    OC, K = w2d_bf16.shape
    M = p_bf16.shape[1]
    cost = pl.CostEstimate(
        flops=int(2 * M * K * OC + 6 * M * OC),
        transcendentals=int(OC),
        bytes_accessed=int(2 * (M * K + K * OC) + 4 * (M * OC + 2 * OC)))
    return pl.pallas_call(
        functools.partial(fused_conv_bn_relu_kernel, inv_m=1.0 / M),
        out_shape=jax.ShapeDtypeStruct((OC, M), jnp.float32),
        grid=(1,),
        in_specs=[pl.BlockSpec((OC, K), lambda i: (0, 0)),
                  pl.BlockSpec((K, M), lambda i: (0, 0)),
                  pl.BlockSpec((OC, 1), lambda i: (0, 0)),
                  pl.BlockSpec((OC, 1), lambda i: (0, 0))],
        out_specs=pl.BlockSpec((OC, M), lambda i: (0, 0)),
        compiler_params=_cparams(("arbitrary",)),
        cost_estimate=cost,
    )(w2d_bf16, p_bf16, gamma, beta)


def conv_matmul_stats(w2d_bf16, p_bf16, tm):
    """Tiled path: y (OC, M) = W (OC, K) @ P (K, M), plus per-tile partial BN statistics."""
    OC, K = w2d_bf16.shape
    M = p_bf16.shape[1]
    nt = M // tm
    cost = pl.CostEstimate(
        flops=int(2 * M * K * OC),
        transcendentals=0,
        bytes_accessed=int(2 * (M * K + K * OC) + 4 * (M * OC + nt * OC * 2)))
    return pl.pallas_call(
        conv_stats_kernel,
        out_shape=(jax.ShapeDtypeStruct((OC, M), jnp.float32),
                   jax.ShapeDtypeStruct((nt, OC, 2), jnp.float32)),
        grid=(nt,),
        in_specs=[pl.BlockSpec((OC, K), lambda i: (0, 0)),     # weights stay resident
                  pl.BlockSpec((K, tm), lambda i: (0, i))],    # patch tiles streamed
        out_specs=(pl.BlockSpec((OC, tm), lambda i: (0, i)),
                   pl.BlockSpec((1, OC, 2), lambda i: (i, 0, 0))),
        compiler_params=_cparams(("parallel",)),
        cost_estimate=cost,
    )(w2d_bf16, p_bf16)


def bn_relu(y, scale, shift, tm):
    OC, M = y.shape
    nt = M // tm
    cost = pl.CostEstimate(flops=int(3 * M * OC), transcendentals=0,
                           bytes_accessed=int(4 * (2 * M * OC + 2 * OC)))
    return pl.pallas_call(
        bn_relu_kernel,
        out_shape=jax.ShapeDtypeStruct((OC, M), jnp.float32),
        grid=(nt,),
        in_specs=[pl.BlockSpec((OC, tm), lambda i: (0, i)),
                  pl.BlockSpec((OC, 1), lambda i: (0, 0)),
                  pl.BlockSpec((OC, 1), lambda i: (0, 0))],
        out_specs=pl.BlockSpec((OC, tm), lambda i: (0, i)),
        compiler_params=_cparams(("parallel",)),
        cost_estimate=cost,
    )(y, scale, shift)


def tiled_matmul(a, b):
    """(R, K) @ (K, N) -> (R, N) f32, tiled over the lane (N) dimension."""
    R, K = a.shape
    N = b.shape[1]
    tn = pick_tile(N)
    nt = N // tn
    cost = pl.CostEstimate(flops=int(2 * R * K * N), transcendentals=0,
                           bytes_accessed=int(2 * (R * K + K * N) + 4 * R * N))
    return pl.pallas_call(
        matmul_kernel,
        out_shape=jax.ShapeDtypeStruct((R, N), jnp.float32),
        grid=(nt,),
        in_specs=[pl.BlockSpec((R, K), lambda i: (0, 0)),
                  pl.BlockSpec((K, tn), lambda i: (0, i))],
        out_specs=pl.BlockSpec((R, tn), lambda i: (0, i)),
        compiler_params=_cparams(("parallel",)),
        cost_estimate=cost,
    )(a, b)


# ------------------------------- JAX glue ----------------------------------

def dilate_and_pad(x_cbhw, stride, pad):
    """Insert (stride-1) zeros between spatial elements, then zero-pad by `pad`."""
    C, B, H, W = x_cbhw.shape
    if stride > 1:
        Hd, Wd = (H - 1) * stride + 1, (W - 1) * stride + 1
        y = jnp.zeros((C, B, Hd, Wd), x_cbhw.dtype)
        y = y.at[:, :, ::stride, ::stride].set(x_cbhw)
    else:
        y = x_cbhw
    return jnp.pad(y, ((0, 0), (0, 0), (pad, pad), (pad, pad)))


def im2col_T(xp_cbhw, k):
    """Patch matrix P (k*k*IC, B*OH*OW), rows ordered (kh, kw, ic), cols (b, oh, ow)."""
    # TODO(synk): for large images / kernels, fuse this into the conv kernel (k*k shifted
    # in-VMEM views) to avoid the ~k^2 HBM inflation of materializing the patch matrix.
    IC, B, Hp, Wp = xp_cbhw.shape
    OH, OW = Hp - k + 1, Wp - k + 1
    rows = []
    for kh in range(k):
        for kw in range(k):
            rows.append(xp_cbhw[:, :, kh:kh + OH, kw:kw + OW])
    p = jnp.stack(rows, axis=0)                       # (k*k, IC, B, OH, OW)
    return p.reshape(k * k * IC, B * OH * OW)


def bilinear_interp_matrix(in_size, scale=2):
    """Dense 1-D bilinear interpolation matrix, PyTorch align_corners=False semantics."""
    out_size = in_size * scale
    j = jnp.arange(out_size, dtype=jnp.float32)
    src = jnp.maximum((j + 0.5) / scale - 0.5, 0.0)
    i0 = jnp.minimum(jnp.floor(src).astype(jnp.int32), in_size - 1)
    i1 = jnp.minimum(i0 + 1, in_size - 1)
    lam = src - i0.astype(jnp.float32)
    m = jnp.zeros((out_size, in_size), jnp.float32)
    rows = jnp.arange(out_size)
    m = m.at[rows, i0].add(1.0 - lam)
    m = m.at[rows, i1].add(lam)
    return m


def bilinear_upsample(z_cbhw):
    """Separable 2x bilinear upsample: one lane-dense matmul per spatial axis."""
    C, B, H, W = z_cbhw.shape
    uh = bilinear_interp_matrix(H).astype(jnp.bfloat16)   # (2H, H)
    uw = bilinear_interp_matrix(W).astype(jnp.bfloat16)   # (2W, W)
    # interpolate along H:  (2H, H) @ (H, C*B*W)
    xa = jnp.transpose(z_cbhw, (2, 0, 1, 3)).reshape(H, C * B * W)
    ta = tiled_matmul(uh, xa.astype(jnp.bfloat16)).reshape(2 * H, C, B, W)
    # interpolate along W:  (2W, W) @ (W, C*B*2H)
    xb = jnp.transpose(ta, (3, 1, 2, 0)).reshape(W, C * B * 2 * H)
    tb = tiled_matmul(uw, xb.astype(jnp.bfloat16)).reshape(2 * W, C, B, 2 * H)
    return jnp.transpose(tb, (1, 2, 3, 0))                # (C, B, 2H, 2W)


def decode_block(x_cbhw, block_params, k, stride, pad, upsample):
    """One DecodeBlock: ConvTranspose2d -> BatchNorm2d -> ReLU -> upsample."""
    w_pt, _bias, gamma, beta = block_params   # conv bias is a provable no-op under batch-stat BN
    pad_amt = k - 1 - pad
    assert pad_amt >= 0, "only padding <= kernel_size - 1 supported"
    xp = dilate_and_pad(x_cbhw, stride, pad_amt)
    IC, B, Hp, Wp = xp.shape
    OH, OW = Hp - k + 1, Wp - k + 1
    M = B * OH * OW
    K = k * k * IC
    OC = w_pt.shape[1]

    patches = im2col_T(xp, k).astype(jnp.bfloat16)                     # (K, M)
    wflip = w_pt[:, :, ::-1, ::-1]                                     # convT == corr with flipped kernel
    w2d = jnp.transpose(wflip, (1, 2, 3, 0)).reshape(OC, K)            # cols ordered (kh, kw, ic)
    w2d = w2d.astype(jnp.bfloat16)

    # Rough per-block VMEM footprint of the fused path (patches double-buffered + f32 y/out).
    fused_bytes = 4 * K * M + 12 * OC * M
    if fused_bytes <= FUSED_BYTES_CAP:
        # Small-M path: whole block core (conv + BN + ReLU) in one kernel, y never leaves VMEM.
        z = fused_conv_bn_relu(w2d, patches,
                               gamma.reshape(OC, 1), beta.reshape(OC, 1))  # (OC, M)
    else:
        # Large-M path: tiled two-pass BN.
        tm = pick_tile(M)
        y, st = conv_matmul_stats(w2d, patches, tm)
        st_sum = jnp.sum(st, axis=0)                                  # (OC, 2)
        mean = st_sum[:, 0] / M
        var = jnp.maximum(st_sum[:, 1] / M - mean * mean, 0.0)
        scale = gamma * jax.lax.rsqrt(var + BN_EPS)
        shift = beta - mean * scale
        z = bn_relu(y, scale.reshape(OC, 1), shift.reshape(OC, 1), tm)     # (OC, M)

    z = z.reshape(OC, B, OH, OW)
    if upsample == 'bilinear':
        z = bilinear_upsample(z)
    # 'identity' -> nothing
    return z


def conv_decoder_forward(x, configs, params):
    B, D = x.shape
    ic = configs['channels'][0][0]
    H = W = int(math.sqrt(D // ic))
    x = x.reshape(B, ic, H, W)                 # matches torch .view(B, in_channel, H, W)
    x = jnp.transpose(x, (1, 0, 2, 3))         # -> (C, B, H, W): spatial on the lane dim
    for i in range(len(configs['channels'])):
        x = decode_block(x, params[i],
                         configs['kernel_sizes'][i],
                         configs['strides'][i],
                         configs['paddings'][i],
                         configs['upsamples'][i])
    return jnp.transpose(x, (1, 0, 2, 3))      # back to NCHW, matching PyTorch output


# --------------------------------- main -------------------------------------

if __name__ == "__main__":
    # Small synthetic config (mirrors ConvDecoder's configs dict):
    #   two DecodeBlocks; first uses F.interpolate (bilinear x2), second nn.Identity().
    configs = {
        'channels': [(4, 8), (8, 3)],
        'kernel_sizes': [3, 3],
        'strides': [1, 1],
        'paddings': [1, 1],
        'upsamples': ['bilinear', 'identity'],
    }

    B = 2
    in_channel = configs['channels'][0][0]
    H = W = 8
    D = in_channel * H * W                    # 4 * 8 * 8 = 256

    key = jax.random.PRNGKey(0)
    keys = jax.random.split(key, 1 + 4 * len(configs['channels']))
    x = jax.random.normal(keys[0], (B, D), dtype=jnp.float32)

    # Deterministic parameter init (synthetic, no checkpoint load).
    params = []
    for i, (ic, oc) in enumerate(configs['channels']):
        k = configs['kernel_sizes'][i]
        kw_, kb_, kg_, kbt_ = keys[1 + 4 * i: 5 + 4 * i]
        fan = ic * k * k
        w = jax.random.normal(kw_, (ic, oc, k, k), jnp.float32) / math.sqrt(fan)
        b = 0.1 * jax.random.normal(kb_, (oc,), jnp.float32)   # kept for parity; no-op under batch-stat BN
        g = 1.0 + 0.1 * jax.random.normal(kg_, (oc,), jnp.float32)
        bt = 0.1 * jax.random.normal(kbt_, (oc,), jnp.float32)
        params.append((w, b, g, bt))

    fwd = jax.jit(functools.partial(conv_decoder_forward, configs=configs, params=params))
    out = jax.block_until_ready(fwd(x))
    assert out.shape == (B, 3, 16, 16), out.shape
    assert bool(jnp.all(jnp.isfinite(out)))
    print("KERNEL_OK")
</pallas_src>

<mosaic_0001>
module attributes {stable_mosaic.version = 11 : i64} {
  func.func private @main(%arg0: i32) attributes {dimension_semantics = [#tpu.dimension_semantics<core_parallel>], iteration_bounds = array<i64: 2>, tpu.core_type = #tpu.core_type<sc_scalar_subcore>, window_params = []} {
    return
  }
}

module attributes {stable_mosaic.version = 11 : i64} {
  func.func private @main(%arg0: i32) attributes {dimension_semantics = [#tpu.dimension_semantics<core_parallel>], iteration_bounds = array<i64: 2>, tpu.core_type = #tpu.core_type<sc_scalar_subcore>, window_params = []} {
    return
  }
}

module attributes {stable_mosaic.version = 11 : i64} {
  func.func @fused_conv_bn_relu_kernel(%arg0: i32, %arg1: memref<8x36xbf16, #tpu.memory_space<vmem>>, %arg2: memref<36x128xbf16, #tpu.memory_space<vmem>>, %arg3: memref<8x1xf32, #tpu.memory_space<vmem>>, %arg4: memref<8x1xf32, #tpu.memory_space<vmem>>, %arg5: memref<8x128xf32, #tpu.memory_space<vmem>>) attributes {dimension_semantics = [#tpu.dimension_semantics<arbitrary>], iteration_bounds = array<i64: 1>, scalar_prefetch = 0 : i64, scratch_operands = 0 : i64, tpu.core_type = #tpu.core_type<tc>, window_params = [{pipeline_mode = #tpu.pipeline_mode<synchronous>, transform_indices = @transform_0, window_bounds = array<i64: 8, 36>}, {pipeline_mode = #tpu.pipeline_mode<synchronous>, transform_indices = @transform_1, window_bounds = array<i64: 36, 128>}, {pipeline_mode = #tpu.pipeline_mode<synchronous>, transform_indices = @transform_2, window_bounds = array<i64: 8, 1>}, {pipeline_mode = #tpu.pipeline_mode<synchronous>, transform_indices = @transform_3, window_bounds = array<i64: 8, 1>}, {pipeline_mode = #tpu.pipeline_mode<synchronous>, transform_indices = @transform_4, window_bounds = array<i64: 8, 128>}]} {
    %c0 = arith.constant 0 : index
    %c0_0 = arith.constant 0 : index
    %0 = vector.load %arg1[%c0, %c0_0] : memref<8x36xbf16, #tpu.memory_space<vmem>>, vector<8x36xbf16>
    %c0_1 = arith.constant 0 : index
    %c0_2 = arith.constant 0 : index
    %1 = vector.load %arg2[%c0_1, %c0_2] : memref<36x128xbf16, #tpu.memory_space<vmem>>, vector<36x128xbf16>
    %cst = arith.constant dense<0.000000e+00> : vector<8x128xf32>
    %2 = tpu.matmul %0, %1, %cst {dimension_numbers = #tpu.dot_dimension_numbers<[1], [0], [0], [1], [0, 0, 1, 1], [], []>} : vector<8x36xbf16>, vector<36x128xbf16>, vector<8x128xf32> -> vector<8x128xf32>
    %cst_3 = arith.constant dense<0.000000e+00> : vector<8xf32>
    %3 = vector.multi_reduction <add>, %2, %cst_3 [1] : vector<8x128xf32> to vector<8xf32>
    %4 = vector.shape_cast %3 : vector<8xf32> to vector<8x1xf32>
    %cst_4 = arith.constant 7.812500e-03 : f32
    %5 = vector.broadcast %cst_4 : f32 to vector<8x1xf32>
    %6 = arith.mulf %4, %5 : vector<8x1xf32>
    %7 = arith.mulf %2, %2 : vector<8x128xf32>
    %cst_5 = arith.constant dense<0.000000e+00> : vector<8xf32>
    %8 = vector.multi_reduction <add>, %7, %cst_5 [1] : vector<8x128xf32> to vector<8xf32>
    %9 = vector.shape_cast %8 : vector<8xf32> to vector<8x1xf32>
    %cst_6 = arith.constant 7.812500e-03 : f32
    %10 = vector.broadcast %cst_6 : f32 to vector<8x1xf32>
    %11 = arith.mulf %9, %10 : vector<8x1xf32>
    %12 = arith.mulf %6, %6 : vector<8x1xf32>
    %13 = arith.subf %11, %12 : vector<8x1xf32>
    %cst_7 = arith.constant 0.000000e+00 : f32
    %14 = vector.broadcast %cst_7 : f32 to vector<8x1xf32>
    %15 = arith.maximumf %13, %14 : vector<8x1xf32>
    %c0_8 = arith.constant 0 : index
    %c0_9 = arith.constant 0 : index
    %16 = vector.load %arg3[%c0_8, %c0_9] : memref<8x1xf32, #tpu.memory_space<vmem>>, vector<8x1xf32>
    %cst_10 = arith.constant 9.99999974E-6 : f32
    %17 = vector.broadcast %cst_10 : f32 to vector<8x1xf32>
    %18 = arith.addf %15, %17 : vector<8x1xf32>
    %19 = math.rsqrt %18 : vector<8x1xf32>
    %20 = arith.mulf %16, %19 : vector<8x1xf32>
    %c0_11 = arith.constant 0 : index
    %c0_12 = arith.constant 0 : index
    %21 = vector.load %arg4[%c0_11, %c0_12] : memref<8x1xf32, #tpu.memory_space<vmem>>, vector<8x1xf32>
    %22 = arith.mulf %6, %20 : vector<8x1xf32>
    %23 = arith.subf %21, %22 : vector<8x1xf32>
    %24 = vector.broadcast %20 : vector<8x1xf32> to vector<8x128xf32>
    %25 = arith.mulf %2, %24 : vector<8x128xf32>
    %26 = vector.broadcast %23 : vector<8x1xf32> to vector<8x128xf32>
    %27 = arith.addf %25, %26 : vector<8x128xf32>
    %cst_13 = arith.constant 0.000000e+00 : f32
    %28 = vector.broadcast %cst_13 : f32 to vector<8x128xf32>
    %29 = arith.maximumf %27, %28 : vector<8x128xf32>
    %c0_14 = arith.constant 0 : index
    %c0_15 = arith.constant 0 : index
    %30 = vector.load %arg5[%c0_14, %c0_15] : memref<8x128xf32, #tpu.memory_space<vmem>>, vector<8x128xf32>
    tpu.vector_store %arg5[%c0_14, %c0_15], %29 {strides = array<i32>} : memref<8x128xf32, #tpu.memory_space<vmem>>, vector<8x128xf32>,
    return
  }
  func.func @transform_0(%arg0: i32) -> (i32, i32) {
    %c0_i32 = arith.constant 0 : i32
    %c0_i32_0 = arith.constant 0 : i32
    %c0_i32_1 = arith.constant 0 : i32
    return %c0_i32, %c0_i32_0 : i32, i32
  }
  func.func @transform_1(%arg0: i32) -> (i32, i32) {
    %c0_i32 = arith.constant 0 : i32
    %c0_i32_0 = arith.constant 0 : i32
    %c0_i32_1 = arith.constant 0 : i32
    return %c0_i32, %c0_i32_0 : i32, i32
  }
  func.func @transform_2(%arg0: i32) -> (i32, i32) {
    %c0_i32 = arith.constant 0 : i32
    %c0_i32_0 = arith.constant 0 : i32
    %c0_i32_1 = arith.constant 0 : i32
    return %c0_i32, %c0_i32_0 : i32, i32
  }
  func.func @transform_3(%arg0: i32) -> (i32, i32) {
    %c0_i32 = arith.constant 0 : i32
    %c0_i32_0 = arith.constant 0 : i32
    %c0_i32_1 = arith.constant 0 : i32
    return %c0_i32, %c0_i32_0 : i32, i32
  }
  func.func @transform_4(%arg0: i32) -> (i32, i32) {
    %c0_i32 = arith.constant 0 : i32
    %c0_i32_0 = arith.constant 0 : i32
    %c0_i32_1 = arith.constant 0 : i32
    return %c0_i32, %c0_i32_0 : i32, i32
  }
}

module attributes {stable_mosaic.version = 11 : i64} {
  func.func @matmul_kernel(%arg0: i32, %arg1: memref<16x8xbf16, #tpu.memory_space<vmem>>, %arg2: memref<8x128xbf16, #tpu.memory_space<vmem>>, %arg3: memref<16x128xf32, #tpu.memory_space<vmem>>) attributes {dimension_semantics = [#tpu.dimension_semantics<parallel>], iteration_bounds = array<i64: 1>, scalar_prefetch = 0 : i64, scratch_operands = 0 : i64, tpu.core_type = #tpu.core_type<tc>, window_params = [{pipeline_mode = #tpu.pipeline_mode<synchronous>, transform_indices = @transform_0, window_bounds = array<i64: 16, 8>}, {transform_indices = @transform_1, window_bounds = array<i64: 8, 128>}, {transform_indices = @transform_2, window_bounds = array<i64: 16, 128>}]} {
    %c0 = arith.constant 0 : index
    %c0_0 = arith.constant 0 : index
    %0 = vector.load %arg1[%c0, %c0_0] : memref<16x8xbf16, #tpu.memory_space<vmem>>, vector<16x8xbf16>
    %c0_1 = arith.constant 0 : index
    %c0_2 = arith.constant 0 : index
    %1 = vector.load %arg2[%c0_1, %c0_2] : memref<8x128xbf16, #tpu.memory_space<vmem>>, vector<8x128xbf16>
    %cst = arith.constant dense<0.000000e+00> : vector<16x128xf32>
    %2 = tpu.matmul %0, %1, %cst {dimension_numbers = #tpu.dot_dimension_numbers<[1], [0], [0], [1], [0, 0, 1, 1], [], []>} : vector<16x8xbf16>, vector<8x128xbf16>, vector<16x128xf32> -> vector<16x128xf32>
    %c0_3 = arith.constant 0 : index
    %c0_4 = arith.constant 0 : index
    %3 = vector.load %arg3[%c0_3, %c0_4] : memref<16x128xf32, #tpu.memory_space<vmem>>, vector<16x128xf32>
    tpu.vector_store %arg3[%c0_3, %c0_4], %2 {strides = array<i32>} : memref<16x128xf32, #tpu.memory_space<vmem>>, vector<16x128xf32>,
    return
  }
  func.func @transform_0(%arg0: i32) -> (i32, i32) {
    %c0_i32 = arith.constant 0 : i32
    %c0_i32_0 = arith.constant 0 : i32
    %c0_i32_1 = arith.constant 0 : i32
    return %c0_i32, %c0_i32_0 : i32, i32
  }
  func.func @transform_1(%arg0: i32) -> (i32, i32) {
    %c0_i32 = arith.constant 0 : i32
    %c0_i32_0 = arith.constant 0 : i32
    return %c0_i32, %arg0 : i32, i32
  }
  func.func @transform_2(%arg0: i32) -> (i32, i32) {
    %c0_i32 = arith.constant 0 : i32
    %c0_i32_0 = arith.constant 0 : i32
    return %c0_i32, %arg0 : i32, i32
  }
}

module attributes {stable_mosaic.version = 11 : i64} {
  func.func @matmul_kernel(%arg0: i32, %arg1: memref<16x8xbf16, #tpu.memory_space<vmem>>, %arg2: memref<8x256xbf16, #tpu.memory_space<vmem>>, %arg3: memref<16x256xf32, #tpu.memory_space<vmem>>) attributes {dimension_semantics = [#tpu.dimension_semantics<parallel>], iteration_bounds = array<i64: 1>, scalar_prefetch = 0 : i64, scratch_operands = 0 : i64, tpu.core_type = #tpu.core_type<tc>, window_params = [{pipeline_mode = #tpu.pipeline_mode<synchronous>, transform_indices = @transform_0, window_bounds = array<i64: 16, 8>}, {transform_indices = @transform_1, window_bounds = array<i64: 8, 256>}, {transform_indices = @transform_2, window_bounds = array<i64: 16, 256>}]} {
    %c0 = arith.constant 0 : index
    %c0_0 = arith.constant 0 : index
    %0 = vector.load %arg1[%c0, %c0_0] : memref<16x8xbf16, #tpu.memory_space<vmem>>, vector<16x8xbf16>
    %c0_1 = arith.constant 0 : index
    %c0_2 = arith.constant 0 : index
    %1 = vector.load %arg2[%c0_1, %c0_2] : memref<8x256xbf16, #tpu.memory_space<vmem>>, vector<8x256xbf16>
    %cst = arith.constant dense<0.000000e+00> : vector<16x256xf32>
    %2 = tpu.matmul %0, %1, %cst {dimension_numbers = #tpu.dot_dimension_numbers<[1], [0], [0], [1], [0, 0, 1, 1], [], []>} : vector<16x8xbf16>, vector<8x256xbf16>, vector<16x256xf32> -> vector<16x256xf32>
    %c0_3 = arith.constant 0 : index
    %c0_4 = arith.constant 0 : index
    %3 = vector.load %arg3[%c0_3, %c0_4] : memref<16x256xf32, #tpu.memory_space<vmem>>, vector<16x256xf32>
    tpu.vector_store %arg3[%c0_3, %c0_4], %2 {strides = array<i32>} : memref<16x256xf32, #tpu.memory_space<vmem>>, vector<16x256xf32>,
    return
  }
  func.func @transform_0(%arg0: i32) -> (i32, i32) {
    %c0_i32 = arith.constant 0 : i32
    %c0_i32_0 = arith.constant 0 : i32
    %c0_i32_1 = arith.constant 0 : i32
    return %c0_i32, %c0_i32_0 : i32, i32
  }
  func.func @transform_1(%arg0: i32) -> (i32, i32) {
    %c0_i32 = arith.constant 0 : i32
    %c0_i32_0 = arith.constant 0 : i32
    return %c0_i32, %arg0 : i32, i32
  }
  func.func @transform_2(%arg0: i32) -> (i32, i32) {
    %c0_i32 = arith.constant 0 : i32
    %c0_i32_0 = arith.constant 0 : i32
    return %c0_i32, %arg0 : i32, i32
  }
}

module attributes {stable_mosaic.version = 11 : i64} {
  func.func @fused_conv_bn_relu_kernel(%arg0: i32, %arg1: memref<3x72xbf16, #tpu.memory_space<vmem>>, %arg2: memref<72x512xbf16, #tpu.memory_space<vmem>>, %arg3: memref<3x1xf32, #tpu.memory_space<vmem>>, %arg4: memref<3x1xf32, #tpu.memory_space<vmem>>, %arg5: memref<3x512xf32, #tpu.memory_space<vmem>>) attributes {dimension_semantics = [#tpu.dimension_semantics<arbitrary>], iteration_bounds = array<i64: 1>, scalar_prefetch = 0 : i64, scratch_operands = 0 : i64, tpu.core_type = #tpu.core_type<tc>, window_params = [{pipeline_mode = #tpu.pipeline_mode<synchronous>, transform_indices = @transform_0, window_bounds = array<i64: 3, 72>}, {pipeline_mode = #tpu.pipeline_mode<synchronous>, transform_indices = @transform_1, window_bounds = array<i64: 72, 512>}, {pipeline_mode = #tpu.pipeline_mode<synchronous>, transform_indices = @transform_2, window_bounds = array<i64: 3, 1>}, {pipeline_mode = #tpu.pipeline_mode<synchronous>, transform_indices = @transform_3, window_bounds = array<i64: 3, 1>}, {pipeline_mode = #tpu.pipeline_mode<synchronous>, transform_indices = @transform_4, window_bounds = array<i64: 3, 512>}]} {
    %c0 = arith.constant 0 : index
    %c0_0 = arith.constant 0 : index
    %0 = vector.load %arg1[%c0, %c0_0] : memref<3x72xbf16, #tpu.memory_space<vmem>>, vector<3x72xbf16>
    %c0_1 = arith.constant 0 : index
    %c0_2 = arith.constant 0 : index
    %1 = vector.load %arg2[%c0_1, %c0_2] : memref<72x512xbf16, #tpu.memory_space<vmem>>, vector<72x512xbf16>
    %cst = arith.constant dense<0.000000e+00> : vector<3x512xf32>
    %2 = tpu.matmul %0, %1, %cst {dimension_numbers = #tpu.dot_dimension_numbers<[1], [0], [0], [1], [0, 0, 1, 1], [], []>} : vector<3x72xbf16>, vector<72x512xbf16>, vector<3x512xf32> -> vector<3x512xf32>
    %cst_3 = arith.constant dense<0.000000e+00> : vector<3xf32>
    %3 = vector.multi_reduction <add>, %2, %cst_3 [1] : vector<3x512xf32> to vector<3xf32>
    %4 = vector.shape_cast %3 : vector<3xf32> to vector<3x1xf32>
    %cst_4 = arith.constant 0.001953125 : f32
    %5 = vector.broadcast %cst_4 : f32 to vector<3x1xf32>
    %6 = arith.mulf %4, %5 : vector<3x1xf32>
    %7 = arith.mulf %2, %2 : vector<3x512xf32>
    %cst_5 = arith.constant dense<0.000000e+00> : vector<3xf32>
    %8 = vector.multi_reduction <add>, %7, %cst_5 [1] : vector<3x512xf32> to vector<3xf32>
    %9 = vector.shape_cast %8 : vector<3xf32> to vector<3x1xf32>
    %cst_6 = arith.constant 0.001953125 : f32
    %10 = vector.broadcast %cst_6 : f32 to vector<3x1xf32>
    %11 = arith.mulf %9, %10 : vector<3x1xf32>
    %12 = arith.mulf %6, %6 : vector<3x1xf32>
    %13 = arith.subf %11, %12 : vector<3x1xf32>
    %cst_7 = arith.constant 0.000000e+00 : f32
    %14 = vector.broadcast %cst_7 : f32 to vector<3x1xf32>
    %15 = arith.maximumf %13, %14 : vector<3x1xf32>
    %c0_8 = arith.constant 0 : index
    %c0_9 = arith.constant 0 : index
    %16 = vector.load %arg3[%c0_8, %c0_9] : memref<3x1xf32, #tpu.memory_space<vmem>>, vector<3x1xf32>
    %cst_10 = arith.constant 9.99999974E-6 : f32
    %17 = vector.broadcast %cst_10 : f32 to vector<3x1xf32>
    %18 = arith.addf %15, %17 : vector<3x1xf32>
    %19 = math.rsqrt %18 : vector<3x1xf32>
    %20 = arith.mulf %16, %19 : vector<3x1xf32>
    %c0_11 = arith.constant 0 : index
    %c0_12 = arith.constant 0 : index
    %21 = vector.load %arg4[%c0_11, %c0_12] : memref<3x1xf32, #tpu.memory_space<vmem>>, vector<3x1xf32>
    %22 = arith.mulf %6, %20 : vector<3x1xf32>
    %23 = arith.subf %21, %22 : vector<3x1xf32>
    %24 = vector.broadcast %20 : vector<3x1xf32> to vector<3x512xf32>
    %25 = arith.mulf %2, %24 : vector<3x512xf32>
    %26 = vector.broadcast %23 : vector<3x1xf32> to vector<3x512xf32>
    %27 = arith.addf %25, %26 : vector<3x512xf32>
    %cst_13 = arith.constant 0.000000e+00 : f32
    %28 = vector.broadcast %cst_13 : f32 to vector<3x512xf32>
    %29 = arith.maximumf %27, %28 : vector<3x512xf32>
    %c0_14 = arith.constant 0 : index
    %c0_15 = arith.constant 0 : index
    %30 = vector.load %arg5[%c0_14, %c0_15] : memref<3x512xf32, #tpu.memory_space<vmem>>, vector<3x512xf32>
    tpu.vector_store %arg5[%c0_14, %c0_15], %29 {strides = array<i32>} : memref<3x512xf32, #tpu.memory_space<vmem>>, vector<3x512xf32>,
    return
  }
  func.func @transform_0(%arg0: i32) -> (i32, i32) {
    %c0_i32 = arith.constant 0 : i32
    %c0_i32_0 = arith.constant 0 : i32
    %c0_i32_1 = arith.constant 0 : i32
    return %c0_i32, %c0_i32_0 : i32, i32
  }
  func.func @transform_1(%arg0: i32) -> (i32, i32) {
    %c0_i32 = arith.constant 0 : i32
    %c0_i32_0 = arith.constant 0 : i32
    %c0_i32_1 = arith.constant 0 : i32
    return %c0_i32, %c0_i32_0 : i32, i32
  }
  func.func @transform_2(%arg0: i32) -> (i32, i32) {
    %c0_i32 = arith.constant 0 : i32
    %c0_i32_0 = arith.constant 0 : i32
    %c0_i32_1 = arith.constant 0 : i32
    return %c0_i32, %c0_i32_0 : i32, i32
  }
  func.func @transform_3(%arg0: i32) -> (i32, i32) {
    %c0_i32 = arith.constant 0 : i32
    %c0_i32_0 = arith.constant 0 : i32
    %c0_i32_1 = arith.constant 0 : i32
    return %c0_i32, %c0_i32_0 : i32, i32
  }
  func.func @transform_4(%arg0: i32) -> (i32, i32) {
    %c0_i32 = arith.constant 0 : i32
    %c0_i32_0 = arith.constant 0 : i32
    %c0_i32_1 = arith.constant 0 : i32
    return %c0_i32, %c0_i32_0 : i32, i32
  }
}

</mosaic_0001>

<bundles_post_ra>
// kernel: conv_decoder_forward.4
= control target key start
LH: loop header
LB: loop body
LE: loop exit
PB: predicated region body
PF: predicated region fallthrough
CT: control target
= control target key end

     0   :  { %vm43_vm0 = vcmask 1041408   ;;  %v150_v0 = vmov 0.0   ;;  %vm151_vm1 = vmmov 0   ;;  %vm39_vm2 = vcmask 293888   ;;  %s199_s1 = inlined_call_operand.vmem [shape: bf16[36,128], index: 1, kind: input, shape index: {}]   ;;  %s200_s0 = inlined_call_operand.vmem [shape: bf16[8,36], index: 0, kind: input, shape index: {}]   ;;  %s201_s2 = inlined_call_operand.vmem [shape: f32[8,1], index: 2, kind: input, shape index: {}]   ;;  %s202_s3 = inlined_call_operand.vmem [shape: f32[8,1], index: 3, kind: input, shape index: {}]   ;;  %s203_s4 = inlined_call_operand.vmem [shape: f32[8,128], index: 4, kind: output, shape index: {}]  }
   0x1   :  { %130 = vmatprep.subr.bf16.mxu0 %v150_v0  ;;  %v145_v1 = vld [vmem:[%s199_s1 + $0x10] ss:$0 sps:$4 sm:$0x33]   ;;  %136 = vmatprep.mubr.msk.bf16.mxu0 %vm151_vm1, %v150_v0  ;;  %v146_v3 = vld [vmem:[%s199_s1 + $0x8] sm:$0xff]   ;;  %v147_v4 = vld [vmem:[%s199_s1] sm:$0xff]   ;;  %v152_v11 = vmov 0  }
   0x2   :  { %v45_v2 = vsel %vm43_vm0, %v145_v1, 0  ;;  %v18_v5 = vld [vmem:[%s200_s0] sm:$0xf]  ;;  %143 = vset.pattern.permute.xlu1 %v152_v11  ;;  %144 = vset.pattern.permute.xlu0 %v152_v11 }
   0x3   :  { %131 = vmatpush3.bf16.msra.mxu0 %v45_v2  ;;  %v97_v20 = vld [vmem:[%s201_s2] sm:$0xff] }
   0x4   :  { %132 = vmatprep.subr.bf16.mxu0 %v150_v0  ;;  %v101_v23 = vld [vmem:[%s202_s3] sm:$0xff] }
   0x7   :  { %133 = vmatpush3.bf16.msra.mxu0 %v146_v3 }
   0x8   :  { %134 = vmatprep.subr.bf16.mxu0 %v150_v0 }
   0xb   :  { %135 = vmatpush3.bf16.msra.mxu0 %v147_v4 }
   0xe   :  { %137 = vmatmul.mubr.msk.bf16.vlgmr.msra.gmra.mxu0 %vm39_vm2, %v18_v5 }
  0xce   :  { %v81_v6 = vpop.f32.mrf.mxu0 }
  0xcf   :  { %87 = vadd.xlane.f32.xlu0 %v81_v6  ;;  %v90_v8 = vmul.f32 %v81_v6, %v81_v6 }
  0xd0   :  { %v138_v7 = vpop.f32.mrf.mxu0 }
  0xd2   :  { %v84_v9 = vpop.f32.mrf.mxu0 }
  0xd3   :  { %91 = vadd.xlane.f32.xlu0 %v90_v8 }
  0xd4   :  { %v139_v10 = vpop.f32.mrf.mxu0 }
 0x158   :  { %v88_v12 = vpop.xlane.xlu0 %87 }
 0x159   :  { %v89_v13 = vmul.f32 0.0078125, %v88_v12 }
 0x15b   :  { %v94_v15 = vmul.f32 %v89_v13, %v89_v13 }
 0x15c   :  { %v92_v14 = vpop.xlane.xlu0 %91 }
 0x15d   :  { %v93_v16 = vmul.f32 0.0078125, %v92_v14 }
 0x15f   :  { %v95_v17 = vsub.f32 %v93_v16, %v94_v15 }
 0x161   :  { %v96_v18 = vmax.f32 %v95_v17, 0.0 }
 0x163   :  { %v98_v19 = vadd.f32 1e-05, %v96_v18 }
 0x165   :  { %148 = vrsqrt.f32 %v98_v19 }
 0x172   :  { %v149_v21 = vpop.eup %148 }
 0x173   :  { %v100_v22 = vmul.f32 %v149_v21, %v97_v20 }
 0x175   :  { %106 = vperm.xlu1 %143, %v100_v22   ;;  %v102_v24 = vmul.f32 %v100_v22, %v89_v13 }
 0x177   :  { %v103_v25 = vsub.f32 %v101_v23, %v102_v24 }
 0x179   :  { %112 = vperm.xlu1 %143, %v103_v25  }
 0x1f0   :  { %v107_v26 = vpop.permute.xlu1 %106 }
 0x1f1   :  { %v109_v27 = vmul.f32 %v107_v26, %v81_v6 }
 0x1f4   :  { %v113_v28 = vpop.permute.xlu1 %112 }
 0x1f5   :  { %v115_v29 = vadd.f32 %v113_v28, %v109_v27 }
 0x1f7   :  { %v116_v30 = vmax.f32 %v115_v29, 0.0 }
 0x1f9   :  { %117 = vst [vmem:[%s203_s4] sm:$0xff] %v116_v30 }

// kernel: conv_decoder_forward.5
= control target key start
LH: loop header
LB: loop body
LE: loop exit
PB: predicated region body
PF: predicated region fallthrough
CT: control target
= control target key end

     0   :  { %vm24_vm0 = vcmask 1043456   ;;  %v88_v0 = vmov 0.0   ;;  %vm89_vm1 = vmmov 0   ;;  %vm20_vm2 = vcmask 64512   ;;  %s117_s1 = inlined_call_operand.vmem [shape: bf16[8,128], index: 1, kind: input, shape index: {}]   ;;  %s118_s0 = inlined_call_operand.vmem [shape: bf16[16,8], index: 0, kind: input, shape index: {}]   ;;  %s119_s2 = inlined_call_operand.vmem [shape: f32[16,128], index: 2, kind: output, shape index: {}]  }
   0x1   :  { %79 = vmatprep.subr.bf16.mxu0 %v88_v0  ;;  %v14_v1 = vld [vmem:[%s117_s1] sm:$0xf]  ;;  %81 = vmatprep.mubr.msk.bf16.mxu0 %vm89_vm1, %v88_v0 }
   0x2   :  { %v26_v2 = vsel %vm24_vm0, %v14_v1, 0  ;;  %v87_v3 = vld [vmem:[%s118_s0] sm:$0xff]  }
   0x3   :  { %80 = vmatpush3.bf16.msra.mxu0 %v26_v2 }
   0x6   :  { %82 = vmatmul.mubr.msk.bf16.vlgmr.msra.gmra.mxu0 %vm20_vm2, %v87_v3 }
  0xc6   :  { %v62_v4 = vpop.f32.mrf.mxu0 }
  0xc7   :  { %69 = vst [vmem:[%s119_s2] sm:$0xff] %v62_v4 }
  0xc8   :  { %v83_v5 = vpop.f32.mrf.mxu0 }
  0xca   :  { %v65_v6 = vpop.f32.mrf.mxu0 }
  0xcb   :  { %70 = vst [vmem:[%s119_s2 + $0x8] sm:$0xff] %v65_v6 }
  0xcc   :  { %v84_v7 = vpop.f32.mrf.mxu0 }

// kernel: conv_decoder_forward.6
= control target key start
LH: loop header
LB: loop body
LE: loop exit
PB: predicated region body
PF: predicated region fallthrough
CT: control target
= control target key end

     0   :  { %vm29_vm0 = vcmask 1043456   ;;  %v96_v1 = vmov 0   ;;  %vm25_vm1 = vcmask 64512   ;;  %s130_s1 = inlined_call_operand.vmem [shape: bf16[8,256], index: 1, kind: input, shape index: {}]   ;;  %s131_s0 = inlined_call_operand.vmem [shape: bf16[16,8], index: 0, kind: input, shape index: {}]   ;;  %s132_s2 = inlined_call_operand.vmem [shape: f32[16,256], index: 2, kind: output, shape index: {}]  }
   0x1   :  { %v14_v0 = vld [vmem:[%s130_s1] sm:$0xff]  ;;  %68 = vmatprep.mubr.bf16.mxu0 %v96_v1 }
   0x2   :  { %v89_v2 = vcombine.high %v14_v0, %v14_v0  ;;  %v88_v3 = vcombine.low %v14_v0, %v14_v0  ;;  %v95_v5 = vld [vmem:[%s131_s0] sm:$0xff]  }
   0x4   :  { %90 = vmatprep.subr.msk.bf16.mxu0 %vm29_vm0, %v89_v2  ;;  %v31_v4 = vsel %vm29_vm0, %v88_v3, 0 }
   0x5   :  { %51 = vmatpush1.bf16.msra.mxu0 %v31_v4 }
   0x8   :  { %91 = vmatmul.mubr.msk.bf16.vlgmr.msra.gmra.mxu0 %vm25_vm1, %v95_v5 }
  0xc8   :  { %v70_v6 = vpop.f32.mrf.mxu0 }
  0xc9   :  { %79 = vst [vmem:[%s132_s2] sm:$0xff] %v70_v6 }
  0xca   :  { %v72_v7 = vpop.f32.mrf.mxu0 }
  0xcb   :  { %80 = vst [vmem:[%s132_s2 + $0x8] sm:$0xff] %v72_v7 }
  0xcc   :  { %v74_v8 = vpop.f32.mrf.mxu0 }
  0xcd   :  { %81 = vst [vmem:[%s132_s2 + $0x10] sm:$0xff] %v74_v8 }
  0xce   :  { %v76_v9 = vpop.f32.mrf.mxu0 }
  0xcf   :  { %82 = vst [vmem:[%s132_s2 + $0x18] sm:$0xff] %v76_v9 }

// kernel: conv_decoder_forward.7
= control target key start
LH: loop header
LB: loop body
LE: loop exit
PB: predicated region body
PF: predicated region fallthrough
CT: control target
= control target key end

     0   :  { %vm131_vm0 = vcmask 1043456   ;;  %v354_v2 = vmov 0   ;;  %vm127_vm1 = vcmask 588800   ;;  %vm226_vm2 = vcmask 1042432   ;;  %s461_s1 = inlined_call_operand.vmem [shape: bf16[72,512], index: 1, kind: input, shape index: {}]   ;;  %s462_s0 = inlined_call_operand.vmem [shape: bf16[3,72], index: 0, kind: input, shape index: {}]   ;;  %s463_s2 = inlined_call_operand.vmem [shape: f32[3,1], index: 2, kind: input, shape index: {}]   ;;  %s464_s3 = inlined_call_operand.vmem [shape: f32[3,1], index: 3, kind: input, shape index: {}]   ;;  %s465_s4 = inlined_call_operand.vmem [shape: f32[3,512], index: 4, kind: output, shape index: {}]  }
   0x1   :  { %v35_v0 = vld [vmem:[%s461_s1 + $0x80] sm:$0xff]  ;;  %v36_v1 = vld [vmem:[%s461_s1 + $0x88] sm:$0xff]  ;;  %176 = vmatprep.mubr.bf16.mxu0 %v354_v2  ;;  %217 = vmatprep.mubr.bf16.mxu1 %v354_v2 }
   0x2   :  { %v314_v3 = vcombine.high %v35_v0, %v35_v0  ;;  %v316_v4 = vcombine.high %v36_v1, %v36_v1  ;;  %v313_v5 = vcombine.low %v35_v0, %v35_v0  ;;  %v315_v6 = vcombine.low %v36_v1, %v36_v1  ;;  %v328_v7 = vld [vmem:[%s461_s1 + $0x64] ss:$16 sps:$4 sm:$0xff]   ;;  %322 = vset.pattern.permute.xlu1 %v354_v2  ;;  %v330_v8 = vld [vmem:[%s461_s1 + $0x6c] ss:$16 sps:$4 sm:$0xff]   ;;  %v332_v11 = vld [vmem:[%s461_s1 + $0x60] ss:$16 sps:$4 sm:$0xff]  }
   0x3   :  { %323 = vset.pattern.permute.xlu0 %v354_v2  ;;  %v333_v12 = vld [vmem:[%s461_s1 + $0x68] ss:$16 sps:$4 sm:$0xff]   ;;  %v334_v13 = vld [vmem:[%s461_s1 + $0x44] ss:$16 sps:$4 sm:$0xff]   ;;  %v336_v14 = vld [vmem:[%s461_s1 + $0x4c] ss:$16 sps:$4 sm:$0xff]  }
   0x4   :  { %317 = vmatprep.subr.msk.bf16.mxu0 %vm131_vm0, %v314_v3  ;;  %319 = vmatprep.subr.msk.bf16.mxu1 %vm131_vm0, %v316_v4  ;;  %v133_v9 = vsel %vm131_vm0, %v313_v5, 0  ;;  %v139_v10 = vsel %vm131_vm0, %v315_v6, 0  ;;  %v338_v15 = vld [vmem:[%s461_s1 + $0x40] ss:$16 sps:$4 sm:$0xff]   ;;  %v339_v16 = vld [vmem:[%s461_s1 + $0x48] ss:$16 sps:$4 sm:$0xff]  }
   0x5   :  { %151 = vmatpush1.bf16.msra.mxu0 %v133_v9  ;;  %192 = vmatpush1.bf16.msra.mxu1 %v139_v10  ;;  %v340_v17 = vld [vmem:[%s461_s1 + $0x24] ss:$16 sps:$4 sm:$0xff]   ;;  %v342_v18 = vld [vmem:[%s461_s1 + $0x2c] ss:$16 sps:$4 sm:$0xff]   ;;  %v344_v19 = vld [vmem:[%s461_s1 + $0x20] ss:$16 sps:$4 sm:$0xff]  }
   0x6   :  { %152 = vmatprep.subr.bf16.mxu0 %v328_v7  ;;  %193 = vmatprep.subr.bf16.mxu1 %v330_v8  ;;  %v345_v20 = vld [vmem:[%s461_s1 + $0x28] ss:$16 sps:$4 sm:$0xff]   ;;  %v346_v21 = vld [vmem:[%s461_s1 + $0x4] ss:$16 sps:$4 sm:$0xff]   ;;  %v348_v22 = vld [vmem:[%s461_s1 + $0xc] ss:$16 sps:$4 sm:$0xff]  }
   0x7   :  { %v350_v23 = vld [vmem:[%s461_s1] ss:$16 sps:$4 sm:$0xff]   ;;  %v351_v24 = vld [vmem:[%s461_s1 + $0x8] ss:$16 sps:$4 sm:$0xff]  }
   0x8   :  { %v18_v25 = vld [vmem:[%s462_s0] sm:$0x3] }
   0x9   :  { %153 = vmatpush1.bf16.msra.mxu0 %v332_v11  ;;  %194 = vmatpush1.bf16.msra.mxu1 %v333_v12  ;;  %v254_v60 = vld [vmem:[%s463_s2] sm:$0x7] }
   0xa   :  { %154 = vmatprep.subr.bf16.mxu0 %v334_v13  ;;  %195 = vmatprep.subr.bf16.mxu1 %v336_v14  ;;  %v258_v63 = vld [vmem:[%s464_s3] sm:$0x7] }
   0xd   :  { %155 = vmatpush1.bf16.msra.mxu0 %v338_v15  ;;  %196 = vmatpush1.bf16.msra.mxu1 %v339_v16 }
   0xe   :  { %156 = vmatprep.subr.bf16.mxu0 %v340_v17  ;;  %197 = vmatprep.subr.bf16.mxu1 %v342_v18 }
  0x11   :  { %157 = vmatpush1.bf16.msra.mxu0 %v344_v19  ;;  %198 = vmatpush1.bf16.msra.mxu1 %v345_v20 }
  0x12   :  { %158 = vmatprep.subr.bf16.mxu0 %v346_v21  ;;  %199 = vmatprep.subr.bf16.mxu1 %v348_v22 }
  0x15   :  { %159 = vmatpush1.bf16.msra.mxu0 %v350_v23  ;;  %200 = vmatpush1.bf16.msra.mxu1 %v351_v24 }
  0x18   :  { %318 = vmatmul.mubr.msk.bf16.vlgmr.msra.gmra.mxu0 %vm127_vm1, %v18_v25  ;;  %320 = vmatmul.mubr.msk.bf16.vlgmr.msra.gmra.mxu1 %vm127_vm1, %v18_v25 }
  0xd8   :  { %v178_v26 = vpop.f32.mrf.mxu0  ;;  %v219_v27 = vpop.f32.mrf.mxu1 }
  0xd9   :  { %v237_v28 = vmul.f32 %v178_v26, %v178_v26  ;;  %v239_v29 = vmul.f32 %v219_v27, %v219_v27  ;;  %v227_v32 = vsel %vm226_vm2, %v178_v26, 0.0  ;;  %v230_v35 = vsel %vm226_vm2, %v219_v27, 0.0 }
  0xda   :  { %v180_v30 = vpop.f32.mrf.mxu0  ;;  %v221_v31 = vpop.f32.mrf.mxu1 }
  0xdb   :  { %v228_v33 = vsel %vm226_vm2, %v180_v30, 0.0  ;;  %v238_v34 = vmul.f32 %v180_v30, %v180_v30  ;;  %v241_v39 = vsel %vm226_vm2, %v237_v28, 0.0  ;;  %v244_v41 = vsel %vm226_vm2, %v239_v29, 0.0 }
  0xdc   :  { %v182_v36 = vpop.f32.mrf.mxu0  ;;  %v223_v37 = vpop.f32.mrf.mxu1  ;;  %v229_v38 = vadd.f32 %v228_v33, %v227_v32  ;;  %v240_v46 = vmul.f32 %v221_v31, %v221_v31  ;;  %v232_v47 = vsel %vm226_vm2, %v221_v31, 0.0 }
  0xdd   :  { %v242_v40 = vsel %vm226_vm2, %v238_v34, 0.0 }
  0xde   :  { %v183_v42 = vpop.f32.mrf.mxu0  ;;  %v224_v43 = vpop.f32.mrf.mxu1  ;;  %v231_v44 = vadd.f32 %v230_v35, %v229_v38  ;;  %v243_v45 = vadd.f32 %v242_v40, %v241_v39  ;;  %v246_v50 = vsel %vm226_vm2, %v240_v46, 0.0 }
  0xe0   :  { %v233_v48 = vadd.f32 %v232_v47, %v231_v44  ;;  %v245_v49 = vadd.f32 %v244_v41, %v243_v45 }
  0xe2   :  { %234 = vadd.xlane.f32.xlu0 %v233_v48  ;;  %v247_v51 = vadd.f32 %v246_v50, %v245_v49 }
  0xe6   :  { %248 = vadd.xlane.f32.xlu0 %v247_v51 }
 0x16b   :  { %v235_v52 = vpop.xlane.xlu0 %234 }
 0x16c   :  { %v236_v53 = vmul.f32 0.001953125, %v235_v52 }
 0x16e   :  { %v251_v55 = vmul.f32 %v236_v53, %v236_v53 }
 0x16f   :  { %v249_v54 = vpop.xlane.xlu0 %248 }
 0x170   :  { %v250_v56 = vmul.f32 0.001953125, %v249_v54 }
 0x172   :  { %v252_v57 = vsub.f32 %v250_v56, %v251_v55 }
 0x174   :  { %v253_v58 = vmax.f32 %v252_v57, 0.0 }
 0x176   :  { %v255_v59 = vadd.f32 1e-05, %v253_v58 }
 0x178   :  { %352 = vrsqrt.f32 %v255_v59 }
 0x185   :  { %v353_v61 = vpop.eup %352 }
 0x186   :  { %v257_v62 = vmul.f32 %v353_v61, %v254_v60 }
 0x188   :  { %263 = vperm.xlu1 %322, %v257_v62   ;;  %v259_v0 = vmul.f32 %v257_v62, %v236_v53 }
 0x18a   :  { %v260_v1 = vsub.f32 %v258_v63, %v259_v0 }
 0x18c   :  { %272 = vperm.xlu1 %322, %v260_v1  }
 0x203   :  { %v264_v2 = vpop.permute.xlu1 %263 }
 0x204   :  { %v266_v3 = vmul.f32 %v264_v2, %v178_v26  ;;  %v267_v4 = vmul.f32 %v264_v2, %v180_v30  ;;  %v268_v5 = vmul.f32 %v264_v2, %v219_v27  ;;  %v269_v6 = vmul.f32 %v264_v2, %v221_v31 }
 0x207   :  { %v273_v7 = vpop.permute.xlu1 %272 }
 0x208   :  { %v275_v8 = vadd.f32 %v273_v7, %v266_v3  ;;  %v276_v9 = vadd.f32 %v273_v7, %v267_v4  ;;  %v277_v10 = vadd.f32 %v273_v7, %v268_v5  ;;  %v278_v11 = vadd.f32 %v273_v7, %v269_v6 }
 0x20a   :  { %v279_v12 = vmax.f32 %v275_v8, 0.0  ;;  %v280_v13 = vmax.f32 %v276_v9, 0.0  ;;  %v281_v14 = vmax.f32 %v277_v10, 0.0  ;;  %v282_v15 = vmax.f32 %v278_v11, 0.0 }
 0x20c   :  { %v287_v16 = vcombine.low %v279_v12, %v280_v13  ;;  %v288_v17 = vcombine.low %v281_v14, %v282_v15 }
 0x20e   :  { %291 = vst [vmem:[%s465_s4] sm:$0x77] %v287_v16  ;;  %292 = vst [vmem:[%s465_s4 + $0x8] sm:$0x77] %v288_v17 }

</bundles_post_ra>
